<compile_context>
chip_gen: v5e
topology: v5e:2x2
jax: 0.10.0
libtpu: 0.0.40
codegen_flags: <defaults>
</compile_context>

<pallas_src>
import functools

import jax
import jax.numpy as jnp
from jax import lax
from jax.experimental import pallas as pl
from jax.experimental.pallas import tpu as pltpu

K = 7     # Conv1d kernel size
PAD = 3   # Conv1d padding (kernel=7, stride=1 -> 'same')


def _basic_block_kernel(x_ref, w1_ref, w2_ref, o_ref, *, compute_dtype):
    """One grid step processes `nb` whole batch elements in native layout.

    x_ref  : (nb, C, L) input dtype   activations
    w1_ref : (K, C, C)  compute dtype conv1 weights, one (C_out, C_in) slab/tap
    w2_ref : (K, C, C)  compute dtype conv2 weights
    o_ref  : (nb, C, L) out dtype     output block
    """
    nb, C, L = x_ref.shape

    # ---- boundary masks: built once, shared by both convs & all nb elements --
    pos = lax.broadcasted_iota(jnp.int32, (C, L), 1)      # position along L
    masks = []
    for k in range(K):
        s = PAD - k
        if s > 0:
            masks.append(pos >= s)        # left zero-padding region
        elif s < 0:
            masks.append(pos < L + s)     # right zero-padding region
        else:
            masks.append(None)            # centre tap needs no mask
    zero_c = jnp.zeros((), compute_dtype)

    def conv(v, w_ref):
        # v: (C, L) compute dtype.  'same' conv as K accumulated MXU matmuls;
        # only one masked+rolled tap is live at a time (no im2col slab).
        acc = None
        for k in range(K):
            s = PAD - k
            tap = v if s == 0 else jnp.roll(v, s, axis=1)   # XLU lane rotate
            if masks[k] is not None:
                tap = jnp.where(masks[k], tap, zero_c)
            p = jnp.dot(w_ref[k], tap, preferred_element_type=jnp.float32)
            acc = p if acc is None else acc + p
        return acc                                          # (C, L) f32

    # TODO(synk): v5e only — if a bundle dump shows the XLU rotate slot
    # saturating at large C*L, benchmark a +/-PAD padded VMEM scratch with 7
    # offset loads per conv instead of the rolls.
    for n in range(nb):                                     # static unroll
        x_in = x_ref[n]                                     # (C, L), input dtype
        h = conv(x_in.astype(compute_dtype), w1_ref)
        h = jnp.maximum(h, 0.0)                             # ReLU (f32)
        # TODO(synk): dropout(p=0.2) is eval-mode identity; training mode would
        # need pltpu.prng_seed / pltpu.prng_random_bits masking here.
        out = conv(h.astype(compute_dtype), w2_ref)
        out = jnp.maximum(out + x_in.astype(jnp.float32), 0.0)  # residual = f32 x
        o_ref[n] = out.astype(o_ref.dtype)


def _chip_traits():
    kind = jax.devices()[0].device_kind.lower()
    is_v5 = "v5" in kind
    is_v7 = "v7" in kind
    phys_vmem = (64 if is_v7 else 128) * 1024 * 1024
    return is_v5, is_v7, phys_vmem


def _pick_batch_tile(N, per_elem_bytes, fixed_bytes, budget, need_two_steps):
    """Largest divisor of N whose per-step footprint fits the VMEM budget,
    keeping >= 2 grid steps on multi-TensorCore chips (v7x megacore)."""
    nb = 1
    for cand in range(1, N + 1):
        if N % cand:
            continue
        if need_two_steps and N >= 2 and N // cand < 2:
            continue
        if fixed_bytes + cand * per_elem_bytes > budget:
            continue
        nb = cand
    return nb


def basic_block_pallas(x, w1, w2, *, out_dtype=jnp.bfloat16,
                       compute_dtype=None, batch_tile=None):
    """x: (N, C, L);  w1, w2: (C_out, C_in, K) in PyTorch Conv1d layout."""
    N, C, L = x.shape
    assert w1.shape == (C, C, K) and w2.shape == (C, C, K)

    is_v5, is_v7, phys_vmem = _chip_traits()
    if compute_dtype is None:
        # bf16 elementwise path on chips with a bf16 VALU (v6e/v7x); f32 on v5.
        compute_dtype = jnp.float32 if is_v5 else jnp.bfloat16

    # Per-step VMEM estimate: double-buffered in/out blocks + resident weights
    # + a few live temporaries (tap / h in compute dtype, f32 accumulator).
    in_b = C * L * jnp.dtype(x.dtype).itemsize
    out_b = C * L * jnp.dtype(out_dtype).itemsize
    cmp_b = C * L * jnp.dtype(compute_dtype).itemsize
    per_elem = 2 * (in_b + out_b) + 4 * cmp_b + 2 * C * L * 4
    w_bytes = 2 * (2 * K * C * C * jnp.dtype(compute_dtype).itemsize)

    if batch_tile is None:
        nb = _pick_batch_tile(N, per_elem, w_bytes, phys_vmem // 2,
                              need_two_steps=is_v7)
    else:
        assert N % batch_tile == 0
        nb = batch_tile
    grid = (N // nb,)

    vmem_limit = int(min(phys_vmem,
                         max(32 * 1024 * 1024, 2 * (w_bytes + nb * per_elem))))

    # Weight layout glue (tiny constants): (C_out, C_in, K) -> (K, C_out, C_in).
    w1_k = jnp.transpose(w1, (2, 0, 1)).astype(compute_dtype)
    w2_k = jnp.transpose(w2, (2, 0, 1)).astype(compute_dtype)

    kernel = functools.partial(_basic_block_kernel, compute_dtype=compute_dtype)

    return pl.pallas_call(
        kernel,
        out_shape=jax.ShapeDtypeStruct((N, C, L), out_dtype),
        grid_spec=pltpu.PrefetchScalarGridSpec(
            num_scalar_prefetch=0,
            grid=grid,
            in_specs=[
                pl.BlockSpec((nb, C, L), lambda i: (i, 0, 0)),
                pl.BlockSpec((K, C, C), lambda i: (0, 0, 0)),
                pl.BlockSpec((K, C, C), lambda i: (0, 0, 0)),
            ],
            out_specs=pl.BlockSpec((nb, C, L), lambda i: (i, 0, 0)),
        ),
        compiler_params=pltpu.CompilerParams(
            dimension_semantics=("parallel",),
            vmem_limit_bytes=vmem_limit),
    )(x, w1_k, w2_k)
    # TODO(synk): for very long L add a second grid axis over L-tiles with a
    # +/-PAD halo index_map to bound per-step VMEM further (mainly v7x).


def basic_block_reference(x, w1, w2, compute_dtype=jnp.float32):
    """Pure-JAX reference with PyTorch Conv1d semantics; `compute_dtype`
    mirrors the kernel's matmul-operand precision (f32 accumulation,
    f32 residual)."""
    dn = ("NCH", "OIH", "NCH")
    h = lax.conv_general_dilated(
        x.astype(compute_dtype), w1.astype(compute_dtype), (1,), [(PAD, PAD)],
        dimension_numbers=dn, preferred_element_type=jnp.float32)
    h = jnp.maximum(h, 0.0)
    o = lax.conv_general_dilated(
        h.astype(compute_dtype), w2.astype(compute_dtype), (1,), [(PAD, PAD)],
        dimension_numbers=dn, preferred_element_type=jnp.float32)
    return jnp.maximum(o + x.astype(jnp.float32), 0.0)


if __name__ == "__main__":
    # Small shapes consistent with BasicBlock(inplanes=8, planes=8, stride=1).
    N, C, L = 2, 8, 16

    key = jax.random.PRNGKey(0)
    kx, k1, k2 = jax.random.split(key, 3)

    x = jax.random.normal(kx, (N, C, L), dtype=jnp.float32)
    # Deterministic weight init (PyTorch layout: (out_ch, in_ch, kernel)).
    fan_in = C * K
    scale = 1.0 / jnp.sqrt(fan_in)
    w1 = jax.random.uniform(k1, (C, C, K), jnp.float32, -scale, scale)
    w2 = jax.random.uniform(k2, (C, C, K), jnp.float32, -scale, scale)

    # Default path: chip-auto compute dtype, bf16 writeback.
    out_bf16 = basic_block_pallas(x, w1, w2)
    # f32 writeback path (behind a flag).
    out_f32 = basic_block_pallas(x, w1, w2, out_dtype=jnp.float32)
    jax.block_until_ready((out_bf16, out_f32))

    assert out_bf16.shape == (N, C, L) and out_bf16.dtype == jnp.bfloat16
    assert out_f32.shape == (N, C, L) and out_f32.dtype == jnp.float32

    # Precision-matched reference (same matmul-operand dtype as the kernel).
    is_v5 = "v5" in jax.devices()[0].device_kind.lower()
    cdt = jnp.float32 if is_v5 else jnp.bfloat16
    ref_matched = basic_block_reference(x, w1, w2, compute_dtype=cdt)
    assert jnp.allclose(out_f32, ref_matched, atol=2e-2, rtol=2e-2), \
        "f32-output mismatch vs precision-matched reference"
    assert jnp.allclose(out_bf16.astype(jnp.float32), ref_matched,
                        atol=5e-2, rtol=5e-2), \
        "bf16-output mismatch vs precision-matched reference"

    # Fidelity vs full-f32 PyTorch-equivalent math (gap = bf16 operand rounding
    # on v6e/v7x; exact on v5e where the compute path stays f32).
    ref_f32 = basic_block_reference(x, w1, w2, compute_dtype=jnp.float32)
    assert jnp.allclose(out_f32, ref_f32, atol=1e-1, rtol=1e-1), \
        "mismatch vs f32 reference"

    print("KERNEL_OK")
</pallas_src>

<mosaic_0001>
module attributes {stable_mosaic.version = 11 : i64} {
  func.func @_basic_block_kernel(%arg0: i32, %arg1: memref<2x8x16xf32, #tpu.memory_space<vmem>>, %arg2: memref<7x8x8xbf16, #tpu.memory_space<vmem>>, %arg3: memref<7x8x8xbf16, #tpu.memory_space<vmem>>, %arg4: memref<2x8x16xbf16, #tpu.memory_space<vmem>>) attributes {dimension_semantics = [#tpu.dimension_semantics<parallel>], iteration_bounds = array<i64: 1>, scalar_prefetch = 0 : i64, scratch_operands = 0 : i64, tpu.core_type = #tpu.core_type<tc>, window_params = [{transform_indices = @transform_0, window_bounds = array<i64: 2, 8, 16>}, {pipeline_mode = #tpu.pipeline_mode<synchronous>, transform_indices = @transform_1, window_bounds = array<i64: 7, 8, 8>}, {pipeline_mode = #tpu.pipeline_mode<synchronous>, transform_indices = @transform_2, window_bounds = array<i64: 7, 8, 8>}, {transform_indices = @transform_3, window_bounds = array<i64: 2, 8, 16>}]} {
    %0 = tpu.iota {dimensions = array<i32: 1>} : vector<8x16xi32>
    %c3_i32 = arith.constant 3 : i32
    %1 = vector.broadcast %c3_i32 : i32 to vector<8x16xi32>
    %2 = arith.cmpi sge, %0, %1 : vector<8x16xi32>
    %c2_i32 = arith.constant 2 : i32
    %3 = vector.broadcast %c2_i32 : i32 to vector<8x16xi32>
    %4 = arith.cmpi sge, %0, %3 : vector<8x16xi32>
    %c1_i32 = arith.constant 1 : i32
    %5 = vector.broadcast %c1_i32 : i32 to vector<8x16xi32>
    %6 = arith.cmpi sge, %0, %5 : vector<8x16xi32>
    %c15_i32 = arith.constant 15 : i32
    %7 = vector.broadcast %c15_i32 : i32 to vector<8x16xi32>
    %8 = arith.cmpi slt, %0, %7 : vector<8x16xi32>
    %c14_i32 = arith.constant 14 : i32
    %9 = vector.broadcast %c14_i32 : i32 to vector<8x16xi32>
    %10 = arith.cmpi slt, %0, %9 : vector<8x16xi32>
    %c13_i32 = arith.constant 13 : i32
    %11 = vector.broadcast %c13_i32 : i32 to vector<8x16xi32>
    %12 = arith.cmpi slt, %0, %11 : vector<8x16xi32>
    %c0 = arith.constant 0 : index
    %c0_0 = arith.constant 0 : index
    %c0_1 = arith.constant 0 : index
    %13 = vector.load %arg1[%c0, %c0_0, %c0_1] : memref<2x8x16xf32, #tpu.memory_space<vmem>>, vector<1x8x16xf32>
    %14 = vector.shape_cast %13 : vector<1x8x16xf32> to vector<8x16xf32>
    %15 = arith.truncf %14 : vector<8x16xf32> to vector<8x16xbf16>
    %16 = vector.extract_strided_slice %15 {offsets = [0, 13], sizes = [8, 3], strides = [1, 1]} : vector<8x16xbf16> to vector<8x3xbf16>
    %17 = vector.extract_strided_slice %15 {offsets = [0, 0], sizes = [8, 13], strides = [1, 1]} : vector<8x16xbf16> to vector<8x13xbf16>
    %18 = tpu.concatenate %16, %17 in 1 : vector<8x3xbf16>, vector<8x13xbf16> -> vector<8x16xbf16>
    %cst = arith.constant 0.000000e+00 : bf16
    %19 = vector.broadcast %cst : bf16 to vector<8x16xbf16>
    %20 = arith.select %2, %18, %19 : vector<8x16xi1>, vector<8x16xbf16>
    %c0_2 = arith.constant 0 : index
    %c0_3 = arith.constant 0 : index
    %c0_4 = arith.constant 0 : index
    %21 = vector.load %arg2[%c0_2, %c0_3, %c0_4] : memref<7x8x8xbf16, #tpu.memory_space<vmem>>, vector<1x8x8xbf16>
    %22 = vector.shape_cast %21 : vector<1x8x8xbf16> to vector<8x8xbf16>
    %cst_5 = arith.constant dense<0.000000e+00> : vector<8x16xf32>
    %23 = tpu.matmul %22, %20, %cst_5 {dimension_numbers = #tpu.dot_dimension_numbers<[1], [0], [0], [1], [0, 0, 1, 1], [], []>} : vector<8x8xbf16>, vector<8x16xbf16>, vector<8x16xf32> -> vector<8x16xf32>
    %24 = vector.extract_strided_slice %15 {offsets = [0, 14], sizes = [8, 2], strides = [1, 1]} : vector<8x16xbf16> to vector<8x2xbf16>
    %25 = vector.extract_strided_slice %15 {offsets = [0, 0], sizes = [8, 14], strides = [1, 1]} : vector<8x16xbf16> to vector<8x14xbf16>
    %26 = tpu.concatenate %24, %25 in 1 : vector<8x2xbf16>, vector<8x14xbf16> -> vector<8x16xbf16>
    %cst_6 = arith.constant 0.000000e+00 : bf16
    %27 = vector.broadcast %cst_6 : bf16 to vector<8x16xbf16>
    %28 = arith.select %4, %26, %27 : vector<8x16xi1>, vector<8x16xbf16>
    %c1 = arith.constant 1 : index
    %c0_7 = arith.constant 0 : index
    %c0_8 = arith.constant 0 : index
    %29 = vector.load %arg2[%c1, %c0_7, %c0_8] : memref<7x8x8xbf16, #tpu.memory_space<vmem>>, vector<1x8x8xbf16>
    %30 = vector.shape_cast %29 : vector<1x8x8xbf16> to vector<8x8xbf16>
    %cst_9 = arith.constant dense<0.000000e+00> : vector<8x16xf32>
    %31 = tpu.matmul %30, %28, %cst_9 {dimension_numbers = #tpu.dot_dimension_numbers<[1], [0], [0], [1], [0, 0, 1, 1], [], []>} : vector<8x8xbf16>, vector<8x16xbf16>, vector<8x16xf32> -> vector<8x16xf32>
    %32 = arith.addf %23, %31 : vector<8x16xf32>
    %33 = vector.extract_strided_slice %15 {offsets = [0, 15], sizes = [8, 1], strides = [1, 1]} : vector<8x16xbf16> to vector<8x1xbf16>
    %34 = vector.extract_strided_slice %15 {offsets = [0, 0], sizes = [8, 15], strides = [1, 1]} : vector<8x16xbf16> to vector<8x15xbf16>
    %35 = tpu.concatenate %33, %34 in 1 : vector<8x1xbf16>, vector<8x15xbf16> -> vector<8x16xbf16>
    %cst_10 = arith.constant 0.000000e+00 : bf16
    %36 = vector.broadcast %cst_10 : bf16 to vector<8x16xbf16>
    %37 = arith.select %6, %35, %36 : vector<8x16xi1>, vector<8x16xbf16>
    %c2 = arith.constant 2 : index
    %c0_11 = arith.constant 0 : index
    %c0_12 = arith.constant 0 : index
    %38 = vector.load %arg2[%c2, %c0_11, %c0_12] : memref<7x8x8xbf16, #tpu.memory_space<vmem>>, vector<1x8x8xbf16>
    %39 = vector.shape_cast %38 : vector<1x8x8xbf16> to vector<8x8xbf16>
    %cst_13 = arith.constant dense<0.000000e+00> : vector<8x16xf32>
    %40 = tpu.matmul %39, %37, %cst_13 {dimension_numbers = #tpu.dot_dimension_numbers<[1], [0], [0], [1], [0, 0, 1, 1], [], []>} : vector<8x8xbf16>, vector<8x16xbf16>, vector<8x16xf32> -> vector<8x16xf32>
    %41 = arith.addf %32, %40 : vector<8x16xf32>
    %c3 = arith.constant 3 : index
    %c0_14 = arith.constant 0 : index
    %c0_15 = arith.constant 0 : index
    %42 = vector.load %arg2[%c3, %c0_14, %c0_15] : memref<7x8x8xbf16, #tpu.memory_space<vmem>>, vector<1x8x8xbf16>
    %43 = vector.shape_cast %42 : vector<1x8x8xbf16> to vector<8x8xbf16>
    %cst_16 = arith.constant dense<0.000000e+00> : vector<8x16xf32>
    %44 = tpu.matmul %43, %15, %cst_16 {dimension_numbers = #tpu.dot_dimension_numbers<[1], [0], [0], [1], [0, 0, 1, 1], [], []>} : vector<8x8xbf16>, vector<8x16xbf16>, vector<8x16xf32> -> vector<8x16xf32>
    %45 = arith.addf %41, %44 : vector<8x16xf32>
    %46 = vector.extract_strided_slice %15 {offsets = [0, 1], sizes = [8, 15], strides = [1, 1]} : vector<8x16xbf16> to vector<8x15xbf16>
    %47 = vector.extract_strided_slice %15 {offsets = [0, 0], sizes = [8, 1], strides = [1, 1]} : vector<8x16xbf16> to vector<8x1xbf16>
    %48 = tpu.concatenate %46, %47 in 1 : vector<8x15xbf16>, vector<8x1xbf16> -> vector<8x16xbf16>
    %cst_17 = arith.constant 0.000000e+00 : bf16
    %49 = vector.broadcast %cst_17 : bf16 to vector<8x16xbf16>
    %50 = arith.select %8, %48, %49 : vector<8x16xi1>, vector<8x16xbf16>
    %c4 = arith.constant 4 : index
    %c0_18 = arith.constant 0 : index
    %c0_19 = arith.constant 0 : index
    %51 = vector.load %arg2[%c4, %c0_18, %c0_19] : memref<7x8x8xbf16, #tpu.memory_space<vmem>>, vector<1x8x8xbf16>
    %52 = vector.shape_cast %51 : vector<1x8x8xbf16> to vector<8x8xbf16>
    %cst_20 = arith.constant dense<0.000000e+00> : vector<8x16xf32>
    %53 = tpu.matmul %52, %50, %cst_20 {dimension_numbers = #tpu.dot_dimension_numbers<[1], [0], [0], [1], [0, 0, 1, 1], [], []>} : vector<8x8xbf16>, vector<8x16xbf16>, vector<8x16xf32> -> vector<8x16xf32>
    %54 = arith.addf %45, %53 : vector<8x16xf32>
    %55 = vector.extract_strided_slice %15 {offsets = [0, 2], sizes = [8, 14], strides = [1, 1]} : vector<8x16xbf16> to vector<8x14xbf16>
    %56 = vector.extract_strided_slice %15 {offsets = [0, 0], sizes = [8, 2], strides = [1, 1]} : vector<8x16xbf16> to vector<8x2xbf16>
    %57 = tpu.concatenate %55, %56 in 1 : vector<8x14xbf16>, vector<8x2xbf16> -> vector<8x16xbf16>
    %cst_21 = arith.constant 0.000000e+00 : bf16
    %58 = vector.broadcast %cst_21 : bf16 to vector<8x16xbf16>
    %59 = arith.select %10, %57, %58 : vector<8x16xi1>, vector<8x16xbf16>
    %c5 = arith.constant 5 : index
    %c0_22 = arith.constant 0 : index
    %c0_23 = arith.constant 0 : index
    %60 = vector.load %arg2[%c5, %c0_22, %c0_23] : memref<7x8x8xbf16, #tpu.memory_space<vmem>>, vector<1x8x8xbf16>
    %61 = vector.shape_cast %60 : vector<1x8x8xbf16> to vector<8x8xbf16>
    %cst_24 = arith.constant dense<0.000000e+00> : vector<8x16xf32>
    %62 = tpu.matmul %61, %59, %cst_24 {dimension_numbers = #tpu.dot_dimension_numbers<[1], [0], [0], [1], [0, 0, 1, 1], [], []>} : vector<8x8xbf16>, vector<8x16xbf16>, vector<8x16xf32> -> vector<8x16xf32>
    %63 = arith.addf %54, %62 : vector<8x16xf32>
    %64 = vector.extract_strided_slice %15 {offsets = [0, 3], sizes = [8, 13], strides = [1, 1]} : vector<8x16xbf16> to vector<8x13xbf16>
    %65 = vector.extract_strided_slice %15 {offsets = [0, 0], sizes = [8, 3], strides = [1, 1]} : vector<8x16xbf16> to vector<8x3xbf16>
    %66 = tpu.concatenate %64, %65 in 1 : vector<8x13xbf16>, vector<8x3xbf16> -> vector<8x16xbf16>
    %cst_25 = arith.constant 0.000000e+00 : bf16
    %67 = vector.broadcast %cst_25 : bf16 to vector<8x16xbf16>
    %68 = arith.select %12, %66, %67 : vector<8x16xi1>, vector<8x16xbf16>
    %c6 = arith.constant 6 : index
    %c0_26 = arith.constant 0 : index
    %c0_27 = arith.constant 0 : index
    %69 = vector.load %arg2[%c6, %c0_26, %c0_27] : memref<7x8x8xbf16, #tpu.memory_space<vmem>>, vector<1x8x8xbf16>
    %70 = vector.shape_cast %69 : vector<1x8x8xbf16> to vector<8x8xbf16>
    %cst_28 = arith.constant dense<0.000000e+00> : vector<8x16xf32>
    %71 = tpu.matmul %70, %68, %cst_28 {dimension_numbers = #tpu.dot_dimension_numbers<[1], [0], [0], [1], [0, 0, 1, 1], [], []>} : vector<8x8xbf16>, vector<8x16xbf16>, vector<8x16xf32> -> vector<8x16xf32>
    %72 = arith.addf %63, %71 : vector<8x16xf32>
    %cst_29 = arith.constant 0.000000e+00 : f32
    %73 = vector.broadcast %cst_29 : f32 to vector<8x16xf32>
    %74 = arith.maximumf %72, %73 : vector<8x16xf32>
    %75 = arith.truncf %74 : vector<8x16xf32> to vector<8x16xbf16>
    %76 = vector.extract_strided_slice %75 {offsets = [0, 13], sizes = [8, 3], strides = [1, 1]} : vector<8x16xbf16> to vector<8x3xbf16>
    %77 = vector.extract_strided_slice %75 {offsets = [0, 0], sizes = [8, 13], strides = [1, 1]} : vector<8x16xbf16> to vector<8x13xbf16>
    %78 = tpu.concatenate %76, %77 in 1 : vector<8x3xbf16>, vector<8x13xbf16> -> vector<8x16xbf16>
    %cst_30 = arith.constant 0.000000e+00 : bf16
    %79 = vector.broadcast %cst_30 : bf16 to vector<8x16xbf16>
    %80 = arith.select %2, %78, %79 : vector<8x16xi1>, vector<8x16xbf16>
    %c0_31 = arith.constant 0 : index
    %c0_32 = arith.constant 0 : index
    %c0_33 = arith.constant 0 : index
    %81 = vector.load %arg3[%c0_31, %c0_32, %c0_33] : memref<7x8x8xbf16, #tpu.memory_space<vmem>>, vector<1x8x8xbf16>
    %82 = vector.shape_cast %81 : vector<1x8x8xbf16> to vector<8x8xbf16>
    %cst_34 = arith.constant dense<0.000000e+00> : vector<8x16xf32>
    %83 = tpu.matmul %82, %80, %cst_34 {dimension_numbers = #tpu.dot_dimension_numbers<[1], [0], [0], [1], [0, 0, 1, 1], [], []>} : vector<8x8xbf16>, vector<8x16xbf16>, vector<8x16xf32> -> vector<8x16xf32>
    %84 = vector.extract_strided_slice %75 {offsets = [0, 14], sizes = [8, 2], strides = [1, 1]} : vector<8x16xbf16> to vector<8x2xbf16>
    %85 = vector.extract_strided_slice %75 {offsets = [0, 0], sizes = [8, 14], strides = [1, 1]} : vector<8x16xbf16> to vector<8x14xbf16>
    %86 = tpu.concatenate %84, %85 in 1 : vector<8x2xbf16>, vector<8x14xbf16> -> vector<8x16xbf16>
    %cst_35 = arith.constant 0.000000e+00 : bf16
    %87 = vector.broadcast %cst_35 : bf16 to vector<8x16xbf16>
    %88 = arith.select %4, %86, %87 : vector<8x16xi1>, vector<8x16xbf16>
    %c1_36 = arith.constant 1 : index
    %c0_37 = arith.constant 0 : index
    %c0_38 = arith.constant 0 : index
    %89 = vector.load %arg3[%c1_36, %c0_37, %c0_38] : memref<7x8x8xbf16, #tpu.memory_space<vmem>>, vector<1x8x8xbf16>
    %90 = vector.shape_cast %89 : vector<1x8x8xbf16> to vector<8x8xbf16>
    %cst_39 = arith.constant dense<0.000000e+00> : vector<8x16xf32>
    %91 = tpu.matmul %90, %88, %cst_39 {dimension_numbers = #tpu.dot_dimension_numbers<[1], [0], [0], [1], [0, 0, 1, 1], [], []>} : vector<8x8xbf16>, vector<8x16xbf16>, vector<8x16xf32> -> vector<8x16xf32>
    %92 = arith.addf %83, %91 : vector<8x16xf32>
    %93 = vector.extract_strided_slice %75 {offsets = [0, 15], sizes = [8, 1], strides = [1, 1]} : vector<8x16xbf16> to vector<8x1xbf16>
    %94 = vector.extract_strided_slice %75 {offsets = [0, 0], sizes = [8, 15], strides = [1, 1]} : vector<8x16xbf16> to vector<8x15xbf16>
    %95 = tpu.concatenate %93, %94 in 1 : vector<8x1xbf16>, vector<8x15xbf16> -> vector<8x16xbf16>
    %cst_40 = arith.constant 0.000000e+00 : bf16
    %96 = vector.broadcast %cst_40 : bf16 to vector<8x16xbf16>
    %97 = arith.select %6, %95, %96 : vector<8x16xi1>, vector<8x16xbf16>
    %c2_41 = arith.constant 2 : index
    %c0_42 = arith.constant 0 : index
    %c0_43 = arith.constant 0 : index
    %98 = vector.load %arg3[%c2_41, %c0_42, %c0_43] : memref<7x8x8xbf16, #tpu.memory_space<vmem>>, vector<1x8x8xbf16>
    %99 = vector.shape_cast %98 : vector<1x8x8xbf16> to vector<8x8xbf16>
    %cst_44 = arith.constant dense<0.000000e+00> : vector<8x16xf32>
    %100 = tpu.matmul %99, %97, %cst_44 {dimension_numbers = #tpu.dot_dimension_numbers<[1], [0], [0], [1], [0, 0, 1, 1], [], []>} : vector<8x8xbf16>, vector<8x16xbf16>, vector<8x16xf32> -> vector<8x16xf32>
    %101 = arith.addf %92, %100 : vector<8x16xf32>
    %c3_45 = arith.constant 3 : index
    %c0_46 = arith.constant 0 : index
    %c0_47 = arith.constant 0 : index
    %102 = vector.load %arg3[%c3_45, %c0_46, %c0_47] : memref<7x8x8xbf16, #tpu.memory_space<vmem>>, vector<1x8x8xbf16>
    %103 = vector.shape_cast %102 : vector<1x8x8xbf16> to vector<8x8xbf16>
    %cst_48 = arith.constant dense<0.000000e+00> : vector<8x16xf32>
    %104 = tpu.matmul %103, %75, %cst_48 {dimension_numbers = #tpu.dot_dimension_numbers<[1], [0], [0], [1], [0, 0, 1, 1], [], []>} : vector<8x8xbf16>, vector<8x16xbf16>, vector<8x16xf32> -> vector<8x16xf32>
    %105 = arith.addf %101, %104 : vector<8x16xf32>
    %106 = vector.extract_strided_slice %75 {offsets = [0, 1], sizes = [8, 15], strides = [1, 1]} : vector<8x16xbf16> to vector<8x15xbf16>
    %107 = vector.extract_strided_slice %75 {offsets = [0, 0], sizes = [8, 1], strides = [1, 1]} : vector<8x16xbf16> to vector<8x1xbf16>
    %108 = tpu.concatenate %106, %107 in 1 : vector<8x15xbf16>, vector<8x1xbf16> -> vector<8x16xbf16>
    %cst_49 = arith.constant 0.000000e+00 : bf16
    %109 = vector.broadcast %cst_49 : bf16 to vector<8x16xbf16>
    %110 = arith.select %8, %108, %109 : vector<8x16xi1>, vector<8x16xbf16>
    %c4_50 = arith.constant 4 : index
    %c0_51 = arith.constant 0 : index
    %c0_52 = arith.constant 0 : index
    %111 = vector.load %arg3[%c4_50, %c0_51, %c0_52] : memref<7x8x8xbf16, #tpu.memory_space<vmem>>, vector<1x8x8xbf16>
    %112 = vector.shape_cast %111 : vector<1x8x8xbf16> to vector<8x8xbf16>
    %cst_53 = arith.constant dense<0.000000e+00> : vector<8x16xf32>
    %113 = tpu.matmul %112, %110, %cst_53 {dimension_numbers = #tpu.dot_dimension_numbers<[1], [0], [0], [1], [0, 0, 1, 1], [], []>} : vector<8x8xbf16>, vector<8x16xbf16>, vector<8x16xf32> -> vector<8x16xf32>
    %114 = arith.addf %105, %113 : vector<8x16xf32>
    %115 = vector.extract_strided_slice %75 {offsets = [0, 2], sizes = [8, 14], strides = [1, 1]} : vector<8x16xbf16> to vector<8x14xbf16>
    %116 = vector.extract_strided_slice %75 {offsets = [0, 0], sizes = [8, 2], strides = [1, 1]} : vector<8x16xbf16> to vector<8x2xbf16>
    %117 = tpu.concatenate %115, %116 in 1 : vector<8x14xbf16>, vector<8x2xbf16> -> vector<8x16xbf16>
    %cst_54 = arith.constant 0.000000e+00 : bf16
    %118 = vector.broadcast %cst_54 : bf16 to vector<8x16xbf16>
    %119 = arith.select %10, %117, %118 : vector<8x16xi1>, vector<8x16xbf16>
    %c5_55 = arith.constant 5 : index
    %c0_56 = arith.constant 0 : index
    %c0_57 = arith.constant 0 : index
    %120 = vector.load %arg3[%c5_55, %c0_56, %c0_57] : memref<7x8x8xbf16, #tpu.memory_space<vmem>>, vector<1x8x8xbf16>
    %121 = vector.shape_cast %120 : vector<1x8x8xbf16> to vector<8x8xbf16>
    %cst_58 = arith.constant dense<0.000000e+00> : vector<8x16xf32>
    %122 = tpu.matmul %121, %119, %cst_58 {dimension_numbers = #tpu.dot_dimension_numbers<[1], [0], [0], [1], [0, 0, 1, 1], [], []>} : vector<8x8xbf16>, vector<8x16xbf16>, vector<8x16xf32> -> vector<8x16xf32>
    %123 = arith.addf %114, %122 : vector<8x16xf32>
    %124 = vector.extract_strided_slice %75 {offsets = [0, 3], sizes = [8, 13], strides = [1, 1]} : vector<8x16xbf16> to vector<8x13xbf16>
    %125 = vector.extract_strided_slice %75 {offsets = [0, 0], sizes = [8, 3], strides = [1, 1]} : vector<8x16xbf16> to vector<8x3xbf16>
    %126 = tpu.concatenate %124, %125 in 1 : vector<8x13xbf16>, vector<8x3xbf16> -> vector<8x16xbf16>
    %cst_59 = arith.constant 0.000000e+00 : bf16
    %127 = vector.broadcast %cst_59 : bf16 to vector<8x16xbf16>
    %128 = arith.select %12, %126, %127 : vector<8x16xi1>, vector<8x16xbf16>
    %c6_60 = arith.constant 6 : index
    %c0_61 = arith.constant 0 : index
    %c0_62 = arith.constant 0 : index
    %129 = vector.load %arg3[%c6_60, %c0_61, %c0_62] : memref<7x8x8xbf16, #tpu.memory_space<vmem>>, vector<1x8x8xbf16>
    %130 = vector.shape_cast %129 : vector<1x8x8xbf16> to vector<8x8xbf16>
    %cst_63 = arith.constant dense<0.000000e+00> : vector<8x16xf32>
    %131 = tpu.matmul %130, %128, %cst_63 {dimension_numbers = #tpu.dot_dimension_numbers<[1], [0], [0], [1], [0, 0, 1, 1], [], []>} : vector<8x8xbf16>, vector<8x16xbf16>, vector<8x16xf32> -> vector<8x16xf32>
    %132 = arith.addf %123, %131 : vector<8x16xf32>
    %133 = arith.addf %132, %14 : vector<8x16xf32>
    %cst_64 = arith.constant 0.000000e+00 : f32
    %134 = vector.broadcast %cst_64 : f32 to vector<8x16xf32>
    %135 = arith.maximumf %133, %134 : vector<8x16xf32>
    %136 = arith.truncf %135 : vector<8x16xf32> to vector<8x16xbf16>
    %c0_65 = arith.constant 0 : index
    %c0_66 = arith.constant 0 : index
    %c0_67 = arith.constant 0 : index
    %137 = vector.load %arg4[%c0_65, %c0_66, %c0_67] : memref<2x8x16xbf16, #tpu.memory_space<vmem>>, vector<1x8x16xbf16>
    %138 = vector.shape_cast %137 : vector<1x8x16xbf16> to vector<8x16xbf16>
    %139 = vector.shape_cast %136 : vector<8x16xbf16> to vector<1x8x16xbf16>
    tpu.vector_store %arg4[%c0_65, %c0_66, %c0_67], %139 {strides = array<i32>} : memref<2x8x16xbf16, #tpu.memory_space<vmem>>, vector<1x8x16xbf16>,
    %c1_68 = arith.constant 1 : index
    %c0_69 = arith.constant 0 : index
    %c0_70 = arith.constant 0 : index
    %140 = vector.load %arg1[%c1_68, %c0_69, %c0_70] : memref<2x8x16xf32, #tpu.memory_space<vmem>>, vector<1x8x16xf32>
    %141 = vector.shape_cast %140 : vector<1x8x16xf32> to vector<8x16xf32>
    %142 = arith.truncf %141 : vector<8x16xf32> to vector<8x16xbf16>
    %143 = vector.extract_strided_slice %142 {offsets = [0, 13], sizes = [8, 3], strides = [1, 1]} : vector<8x16xbf16> to vector<8x3xbf16>
    %144 = vector.extract_strided_slice %142 {offsets = [0, 0], sizes = [8, 13], strides = [1, 1]} : vector<8x16xbf16> to vector<8x13xbf16>
    %145 = tpu.concatenate %143, %144 in 1 : vector<8x3xbf16>, vector<8x13xbf16> -> vector<8x16xbf16>
    %cst_71 = arith.constant 0.000000e+00 : bf16
    %146 = vector.broadcast %cst_71 : bf16 to vector<8x16xbf16>
    %147 = arith.select %2, %145, %146 : vector<8x16xi1>, vector<8x16xbf16>
    %c0_72 = arith.constant 0 : index
    %c0_73 = arith.constant 0 : index
    %c0_74 = arith.constant 0 : index
    %148 = vector.load %arg2[%c0_72, %c0_73, %c0_74] : memref<7x8x8xbf16, #tpu.memory_space<vmem>>, vector<1x8x8xbf16>
    %149 = vector.shape_cast %148 : vector<1x8x8xbf16> to vector<8x8xbf16>
    %cst_75 = arith.constant dense<0.000000e+00> : vector<8x16xf32>
    %150 = tpu.matmul %149, %147, %cst_75 {dimension_numbers = #tpu.dot_dimension_numbers<[1], [0], [0], [1], [0, 0, 1, 1], [], []>} : vector<8x8xbf16>, vector<8x16xbf16>, vector<8x16xf32> -> vector<8x16xf32>
    %151 = vector.extract_strided_slice %142 {offsets = [0, 14], sizes = [8, 2], strides = [1, 1]} : vector<8x16xbf16> to vector<8x2xbf16>
    %152 = vector.extract_strided_slice %142 {offsets = [0, 0], sizes = [8, 14], strides = [1, 1]} : vector<8x16xbf16> to vector<8x14xbf16>
    %153 = tpu.concatenate %151, %152 in 1 : vector<8x2xbf16>, vector<8x14xbf16> -> vector<8x16xbf16>
    %cst_76 = arith.constant 0.000000e+00 : bf16
    %154 = vector.broadcast %cst_76 : bf16 to vector<8x16xbf16>
    %155 = arith.select %4, %153, %154 : vector<8x16xi1>, vector<8x16xbf16>
    %c1_77 = arith.constant 1 : index
    %c0_78 = arith.constant 0 : index
    %c0_79 = arith.constant 0 : index
    %156 = vector.load %arg2[%c1_77, %c0_78, %c0_79] : memref<7x8x8xbf16, #tpu.memory_space<vmem>>, vector<1x8x8xbf16>
    %157 = vector.shape_cast %156 : vector<1x8x8xbf16> to vector<8x8xbf16>
    %cst_80 = arith.constant dense<0.000000e+00> : vector<8x16xf32>
    %158 = tpu.matmul %157, %155, %cst_80 {dimension_numbers = #tpu.dot_dimension_numbers<[1], [0], [0], [1], [0, 0, 1, 1], [], []>} : vector<8x8xbf16>, vector<8x16xbf16>, vector<8x16xf32> -> vector<8x16xf32>
    %159 = arith.addf %150, %158 : vector<8x16xf32>
    %160 = vector.extract_strided_slice %142 {offsets = [0, 15], sizes = [8, 1], strides = [1, 1]} : vector<8x16xbf16> to vector<8x1xbf16>
    %161 = vector.extract_strided_slice %142 {offsets = [0, 0], sizes = [8, 15], strides = [1, 1]} : vector<8x16xbf16> to vector<8x15xbf16>
    %162 = tpu.concatenate %160, %161 in 1 : vector<8x1xbf16>, vector<8x15xbf16> -> vector<8x16xbf16>
    %cst_81 = arith.constant 0.000000e+00 : bf16
    %163 = vector.broadcast %cst_81 : bf16 to vector<8x16xbf16>
    %164 = arith.select %6, %162, %163 : vector<8x16xi1>, vector<8x16xbf16>
    %c2_82 = arith.constant 2 : index
    %c0_83 = arith.constant 0 : index
    %c0_84 = arith.constant 0 : index
    %165 = vector.load %arg2[%c2_82, %c0_83, %c0_84] : memref<7x8x8xbf16, #tpu.memory_space<vmem>>, vector<1x8x8xbf16>
    %166 = vector.shape_cast %165 : vector<1x8x8xbf16> to vector<8x8xbf16>
    %cst_85 = arith.constant dense<0.000000e+00> : vector<8x16xf32>
    %167 = tpu.matmul %166, %164, %cst_85 {dimension_numbers = #tpu.dot_dimension_numbers<[1], [0], [0], [1], [0, 0, 1, 1], [], []>} : vector<8x8xbf16>, vector<8x16xbf16>, vector<8x16xf32> -> vector<8x16xf32>
    %168 = arith.addf %159, %167 : vector<8x16xf32>
    %c3_86 = arith.constant 3 : index
    %c0_87 = arith.constant 0 : index
    %c0_88 = arith.constant 0 : index
    %169 = vector.load %arg2[%c3_86, %c0_87, %c0_88] : memref<7x8x8xbf16, #tpu.memory_space<vmem>>, vector<1x8x8xbf16>
    %170 = vector.shape_cast %169 : vector<1x8x8xbf16> to vector<8x8xbf16>
    %cst_89 = arith.constant dense<0.000000e+00> : vector<8x16xf32>
    %171 = tpu.matmul %170, %142, %cst_89 {dimension_numbers = #tpu.dot_dimension_numbers<[1], [0], [0], [1], [0, 0, 1, 1], [], []>} : vector<8x8xbf16>, vector<8x16xbf16>, vector<8x16xf32> -> vector<8x16xf32>
    %172 = arith.addf %168, %171 : vector<8x16xf32>
    %173 = vector.extract_strided_slice %142 {offsets = [0, 1], sizes = [8, 15], strides = [1, 1]} : vector<8x16xbf16> to vector<8x15xbf16>
    %174 = vector.extract_strided_slice %142 {offsets = [0, 0], sizes = [8, 1], strides = [1, 1]} : vector<8x16xbf16> to vector<8x1xbf16>
    %175 = tpu.concatenate %173, %174 in 1 : vector<8x15xbf16>, vector<8x1xbf16> -> vector<8x16xbf16>
    %cst_90 = arith.constant 0.000000e+00 : bf16
    %176 = vector.broadcast %cst_90 : bf16 to vector<8x16xbf16>
    %177 = arith.select %8, %175, %176 : vector<8x16xi1>, vector<8x16xbf16>
    %c4_91 = arith.constant 4 : index
    %c0_92 = arith.constant 0 : index
    %c0_93 = arith.constant 0 : index
    %178 = vector.load %arg2[%c4_91, %c0_92, %c0_93] : memref<7x8x8xbf16, #tpu.memory_space<vmem>>, vector<1x8x8xbf16>
    %179 = vector.shape_cast %178 : vector<1x8x8xbf16> to vector<8x8xbf16>
    %cst_94 = arith.constant dense<0.000000e+00> : vector<8x16xf32>
    %180 = tpu.matmul %179, %177, %cst_94 {dimension_numbers = #tpu.dot_dimension_numbers<[1], [0], [0], [1], [0, 0, 1, 1], [], []>} : vector<8x8xbf16>, vector<8x16xbf16>, vector<8x16xf32> -> vector<8x16xf32>
    %181 = arith.addf %172, %180 : vector<8x16xf32>
    %182 = vector.extract_strided_slice %142 {offsets = [0, 2], sizes = [8, 14], strides = [1, 1]} : vector<8x16xbf16> to vector<8x14xbf16>
    %183 = vector.extract_strided_slice %142 {offsets = [0, 0], sizes = [8, 2], strides = [1, 1]} : vector<8x16xbf16> to vector<8x2xbf16>
    %184 = tpu.concatenate %182, %183 in 1 : vector<8x14xbf16>, vector<8x2xbf16> -> vector<8x16xbf16>
    %cst_95 = arith.constant 0.000000e+00 : bf16
    %185 = vector.broadcast %cst_95 : bf16 to vector<8x16xbf16>
    %186 = arith.select %10, %184, %185 : vector<8x16xi1>, vector<8x16xbf16>
    %c5_96 = arith.constant 5 : index
    %c0_97 = arith.constant 0 : index
    %c0_98 = arith.constant 0 : index
    %187 = vector.load %arg2[%c5_96, %c0_97, %c0_98] : memref<7x8x8xbf16, #tpu.memory_space<vmem>>, vector<1x8x8xbf16>
    %188 = vector.shape_cast %187 : vector<1x8x8xbf16> to vector<8x8xbf16>
    %cst_99 = arith.constant dense<0.000000e+00> : vector<8x16xf32>
    %189 = tpu.matmul %188, %186, %cst_99 {dimension_numbers = #tpu.dot_dimension_numbers<[1], [0], [0], [1], [0, 0, 1, 1], [], []>} : vector<8x8xbf16>, vector<8x16xbf16>, vector<8x16xf32> -> vector<8x16xf32>
    %190 = arith.addf %181, %189 : vector<8x16xf32>
    %191 = vector.extract_strided_slice %142 {offsets = [0, 3], sizes = [8, 13], strides = [1, 1]} : vector<8x16xbf16> to vector<8x13xbf16>
    %192 = vector.extract_strided_slice %142 {offsets = [0, 0], sizes = [8, 3], strides = [1, 1]} : vector<8x16xbf16> to vector<8x3xbf16>
    %193 = tpu.concatenate %191, %192 in 1 : vector<8x13xbf16>, vector<8x3xbf16> -> vector<8x16xbf16>
    %cst_100 = arith.constant 0.000000e+00 : bf16
    %194 = vector.broadcast %cst_100 : bf16 to vector<8x16xbf16>
    %195 = arith.select %12, %193, %194 : vector<8x16xi1>, vector<8x16xbf16>
    %c6_101 = arith.constant 6 : index
    %c0_102 = arith.constant 0 : index
    %c0_103 = arith.constant 0 : index
    %196 = vector.load %arg2[%c6_101, %c0_102, %c0_103] : memref<7x8x8xbf16, #tpu.memory_space<vmem>>, vector<1x8x8xbf16>
    %197 = vector.shape_cast %196 : vector<1x8x8xbf16> to vector<8x8xbf16>
    %cst_104 = arith.constant dense<0.000000e+00> : vector<8x16xf32>
    %198 = tpu.matmul %197, %195, %cst_104 {dimension_numbers = #tpu.dot_dimension_numbers<[1], [0], [0], [1], [0, 0, 1, 1], [], []>} : vector<8x8xbf16>, vector<8x16xbf16>, vector<8x16xf32> -> vector<8x16xf32>
    %199 = arith.addf %190, %198 : vector<8x16xf32>
    %cst_105 = arith.constant 0.000000e+00 : f32
    %200 = vector.broadcast %cst_105 : f32 to vector<8x16xf32>
    %201 = arith.maximumf %199, %200 : vector<8x16xf32>
    %202 = arith.truncf %201 : vector<8x16xf32> to vector<8x16xbf16>
    %203 = vector.extract_strided_slice %202 {offsets = [0, 13], sizes = [8, 3], strides = [1, 1]} : vector<8x16xbf16> to vector<8x3xbf16>
    %204 = vector.extract_strided_slice %202 {offsets = [0, 0], sizes = [8, 13], strides = [1, 1]} : vector<8x16xbf16> to vector<8x13xbf16>
    %205 = tpu.concatenate %203, %204 in 1 : vector<8x3xbf16>, vector<8x13xbf16> -> vector<8x16xbf16>
    %cst_106 = arith.constant 0.000000e+00 : bf16
    %206 = vector.broadcast %cst_106 : bf16 to vector<8x16xbf16>
    %207 = arith.select %2, %205, %206 : vector<8x16xi1>, vector<8x16xbf16>
    %c0_107 = arith.constant 0 : index
    %c0_108 = arith.constant 0 : index
    %c0_109 = arith.constant 0 : index
    %208 = vector.load %arg3[%c0_107, %c0_108, %c0_109] : memref<7x8x8xbf16, #tpu.memory_space<vmem>>, vector<1x8x8xbf16>
    %209 = vector.shape_cast %208 : vector<1x8x8xbf16> to vector<8x8xbf16>
    %cst_110 = arith.constant dense<0.000000e+00> : vector<8x16xf32>
    %210 = tpu.matmul %209, %207, %cst_110 {dimension_numbers = #tpu.dot_dimension_numbers<[1], [0], [0], [1], [0, 0, 1, 1], [], []>} : vector<8x8xbf16>, vector<8x16xbf16>, vector<8x16xf32> -> vector<8x16xf32>
    %211 = vector.extract_strided_slice %202 {offsets = [0, 14], sizes = [8, 2], strides = [1, 1]} : vector<8x16xbf16> to vector<8x2xbf16>
    %212 = vector.extract_strided_slice %202 {offsets = [0, 0], sizes = [8, 14], strides = [1, 1]} : vector<8x16xbf16> to vector<8x14xbf16>
    %213 = tpu.concatenate %211, %212 in 1 : vector<8x2xbf16>, vector<8x14xbf16> -> vector<8x16xbf16>
    %cst_111 = arith.constant 0.000000e+00 : bf16
    %214 = vector.broadcast %cst_111 : bf16 to vector<8x16xbf16>
    %215 = arith.select %4, %213, %214 : vector<8x16xi1>, vector<8x16xbf16>
    %c1_112 = arith.constant 1 : index
    %c0_113 = arith.constant 0 : index
    %c0_114 = arith.constant 0 : index
    %216 = vector.load %arg3[%c1_112, %c0_113, %c0_114] : memref<7x8x8xbf16, #tpu.memory_space<vmem>>, vector<1x8x8xbf16>
    %217 = vector.shape_cast %216 : vector<1x8x8xbf16> to vector<8x8xbf16>
    %cst_115 = arith.constant dense<0.000000e+00> : vector<8x16xf32>
    %218 = tpu.matmul %217, %215, %cst_115 {dimension_numbers = #tpu.dot_dimension_numbers<[1], [0], [0], [1], [0, 0, 1, 1], [], []>} : vector<8x8xbf16>, vector<8x16xbf16>, vector<8x16xf32> -> vector<8x16xf32>
    %219 = arith.addf %210, %218 : vector<8x16xf32>
    %220 = vector.extract_strided_slice %202 {offsets = [0, 15], sizes = [8, 1], strides = [1, 1]} : vector<8x16xbf16> to vector<8x1xbf16>
    %221 = vector.extract_strided_slice %202 {offsets = [0, 0], sizes = [8, 15], strides = [1, 1]} : vector<8x16xbf16> to vector<8x15xbf16>
    %222 = tpu.concatenate %220, %221 in 1 : vector<8x1xbf16>, vector<8x15xbf16> -> vector<8x16xbf16>
    %cst_116 = arith.constant 0.000000e+00 : bf16
    %223 = vector.broadcast %cst_116 : bf16 to vector<8x16xbf16>
    %224 = arith.select %6, %222, %223 : vector<8x16xi1>, vector<8x16xbf16>
    %c2_117 = arith.constant 2 : index
    %c0_118 = arith.constant 0 : index
    %c0_119 = arith.constant 0 : index
    %225 = vector.load %arg3[%c2_117, %c0_118, %c0_119] : memref<7x8x8xbf16, #tpu.memory_space<vmem>>, vector<1x8x8xbf16>
    %226 = vector.shape_cast %225 : vector<1x8x8xbf16> to vector<8x8xbf16>
    %cst_120 = arith.constant dense<0.000000e+00> : vector<8x16xf32>
    %227 = tpu.matmul %226, %224, %cst_120 {dimension_numbers = #tpu.dot_dimension_numbers<[1], [0], [0], [1], [0, 0, 1, 1], [], []>} : vector<8x8xbf16>, vector<8x16xbf16>, vector<8x16xf32> -> vector<8x16xf32>
    %228 = arith.addf %219, %227 : vector<8x16xf32>
    %c3_121 = arith.constant 3 : index
    %c0_122 = arith.constant 0 : index
    %c0_123 = arith.constant 0 : index
    %229 = vector.load %arg3[%c3_121, %c0_122, %c0_123] : memref<7x8x8xbf16, #tpu.memory_space<vmem>>, vector<1x8x8xbf16>
    %230 = vector.shape_cast %229 : vector<1x8x8xbf16> to vector<8x8xbf16>
    %cst_124 = arith.constant dense<0.000000e+00> : vector<8x16xf32>
    %231 = tpu.matmul %230, %202, %cst_124 {dimension_numbers = #tpu.dot_dimension_numbers<[1], [0], [0], [1], [0, 0, 1, 1], [], []>} : vector<8x8xbf16>, vector<8x16xbf16>, vector<8x16xf32> -> vector<8x16xf32>
    %232 = arith.addf %228, %231 : vector<8x16xf32>
    %233 = vector.extract_strided_slice %202 {offsets = [0, 1], sizes = [8, 15], strides = [1, 1]} : vector<8x16xbf16> to vector<8x15xbf16>
    %234 = vector.extract_strided_slice %202 {offsets = [0, 0], sizes = [8, 1], strides = [1, 1]} : vector<8x16xbf16> to vector<8x1xbf16>
    %235 = tpu.concatenate %233, %234 in 1 : vector<8x15xbf16>, vector<8x1xbf16> -> vector<8x16xbf16>
    %cst_125 = arith.constant 0.000000e+00 : bf16
    %236 = vector.broadcast %cst_125 : bf16 to vector<8x16xbf16>
    %237 = arith.select %8, %235, %236 : vector<8x16xi1>, vector<8x16xbf16>
    %c4_126 = arith.constant 4 : index
    %c0_127 = arith.constant 0 : index
    %c0_128 = arith.constant 0 : index
    %238 = vector.load %arg3[%c4_126, %c0_127, %c0_128] : memref<7x8x8xbf16, #tpu.memory_space<vmem>>, vector<1x8x8xbf16>
    %239 = vector.shape_cast %238 : vector<1x8x8xbf16> to vector<8x8xbf16>
    %cst_129 = arith.constant dense<0.000000e+00> : vector<8x16xf32>
    %240 = tpu.matmul %239, %237, %cst_129 {dimension_numbers = #tpu.dot_dimension_numbers<[1], [0], [0], [1], [0, 0, 1, 1], [], []>} : vector<8x8xbf16>, vector<8x16xbf16>, vector<8x16xf32> -> vector<8x16xf32>
    %241 = arith.addf %232, %240 : vector<8x16xf32>
    %242 = vector.extract_strided_slice %202 {offsets = [0, 2], sizes = [8, 14], strides = [1, 1]} : vector<8x16xbf16> to vector<8x14xbf16>
    %243 = vector.extract_strided_slice %202 {offsets = [0, 0], sizes = [8, 2], strides = [1, 1]} : vector<8x16xbf16> to vector<8x2xbf16>
    %244 = tpu.concatenate %242, %243 in 1 : vector<8x14xbf16>, vector<8x2xbf16> -> vector<8x16xbf16>
    %cst_130 = arith.constant 0.000000e+00 : bf16
    %245 = vector.broadcast %cst_130 : bf16 to vector<8x16xbf16>
    %246 = arith.select %10, %244, %245 : vector<8x16xi1>, vector<8x16xbf16>
    %c5_131 = arith.constant 5 : index
    %c0_132 = arith.constant 0 : index
    %c0_133 = arith.constant 0 : index
    %247 = vector.load %arg3[%c5_131, %c0_132, %c0_133] : memref<7x8x8xbf16, #tpu.memory_space<vmem>>, vector<1x8x8xbf16>
    %248 = vector.shape_cast %247 : vector<1x8x8xbf16> to vector<8x8xbf16>
    %cst_134 = arith.constant dense<0.000000e+00> : vector<8x16xf32>
    %249 = tpu.matmul %248, %246, %cst_134 {dimension_numbers = #tpu.dot_dimension_numbers<[1], [0], [0], [1], [0, 0, 1, 1], [], []>} : vector<8x8xbf16>, vector<8x16xbf16>, vector<8x16xf32> -> vector<8x16xf32>
    %250 = arith.addf %241, %249 : vector<8x16xf32>
    %251 = vector.extract_strided_slice %202 {offsets = [0, 3], sizes = [8, 13], strides = [1, 1]} : vector<8x16xbf16> to vector<8x13xbf16>
    %252 = vector.extract_strided_slice %202 {offsets = [0, 0], sizes = [8, 3], strides = [1, 1]} : vector<8x16xbf16> to vector<8x3xbf16>
    %253 = tpu.concatenate %251, %252 in 1 : vector<8x13xbf16>, vector<8x3xbf16> -> vector<8x16xbf16>
    %cst_135 = arith.constant 0.000000e+00 : bf16
    %254 = vector.broadcast %cst_135 : bf16 to vector<8x16xbf16>
    %255 = arith.select %12, %253, %254 : vector<8x16xi1>, vector<8x16xbf16>
    %c6_136 = arith.constant 6 : index
    %c0_137 = arith.constant 0 : index
    %c0_138 = arith.constant 0 : index
    %256 = vector.load %arg3[%c6_136, %c0_137, %c0_138] : memref<7x8x8xbf16, #tpu.memory_space<vmem>>, vector<1x8x8xbf16>
    %257 = vector.shape_cast %256 : vector<1x8x8xbf16> to vector<8x8xbf16>
    %cst_139 = arith.constant dense<0.000000e+00> : vector<8x16xf32>
    %258 = tpu.matmul %257, %255, %cst_139 {dimension_numbers = #tpu.dot_dimension_numbers<[1], [0], [0], [1], [0, 0, 1, 1], [], []>} : vector<8x8xbf16>, vector<8x16xbf16>, vector<8x16xf32> -> vector<8x16xf32>
    %259 = arith.addf %250, %258 : vector<8x16xf32>
    %260 = arith.addf %259, %141 : vector<8x16xf32>
    %cst_140 = arith.constant 0.000000e+00 : f32
    %261 = vector.broadcast %cst_140 : f32 to vector<8x16xf32>
    %262 = arith.maximumf %260, %261 : vector<8x16xf32>
    %263 = arith.truncf %262 : vector<8x16xf32> to vector<8x16xbf16>
    %c1_141 = arith.constant 1 : index
    %c0_142 = arith.constant 0 : index
    %c0_143 = arith.constant 0 : index
    %264 = vector.load %arg4[%c1_141, %c0_142, %c0_143] : memref<2x8x16xbf16, #tpu.memory_space<vmem>>, vector<1x8x16xbf16>
    %265 = vector.shape_cast %264 : vector<1x8x16xbf16> to vector<8x16xbf16>
    %266 = vector.shape_cast %263 : vector<8x16xbf16> to vector<1x8x16xbf16>
    tpu.vector_store %arg4[%c1_141, %c0_142, %c0_143], %266 {strides = array<i32>} : memref<2x8x16xbf16, #tpu.memory_space<vmem>>, vector<1x8x16xbf16>,
    return
  }
  func.func @transform_0(%arg0: i32) -> (i32, i32, i32) {
    %c0_i32 = arith.constant 0 : i32
    %c0_i32_0 = arith.constant 0 : i32
    %c0_i32_1 = arith.constant 0 : i32
    return %arg0, %c0_i32, %c0_i32_0 : i32, i32, i32
  }
  func.func @transform_1(%arg0: i32) -> (i32, i32, i32) {
    %c0_i32 = arith.constant 0 : i32
    %c0_i32_0 = arith.constant 0 : i32
    %c0_i32_1 = arith.constant 0 : i32
    %c0_i32_2 = arith.constant 0 : i32
    return %c0_i32, %c0_i32_0, %c0_i32_1 : i32, i32, i32
  }
  func.func @transform_2(%arg0: i32) -> (i32, i32, i32) {
    %c0_i32 = arith.constant 0 : i32
    %c0_i32_0 = arith.constant 0 : i32
    %c0_i32_1 = arith.constant 0 : i32
    %c0_i32_2 = arith.constant 0 : i32
    return %c0_i32, %c0_i32_0, %c0_i32_1 : i32, i32, i32
  }
  func.func @transform_3(%arg0: i32) -> (i32, i32, i32) {
    %c0_i32 = arith.constant 0 : i32
    %c0_i32_0 = arith.constant 0 : i32
    %c0_i32_1 = arith.constant 0 : i32
    return %arg0, %c0_i32, %c0_i32_0 : i32, i32, i32
  }
}

</mosaic_0001>

<bundles_post_ra>
// kernel: tpu_custom_call.1
= control target key start
LH: loop header
LB: loop body
LE: loop exit
PB: predicated region body
PF: predicated region fallthrough
CT: control target
= control target key end

     0   :  { %8 = vsyncpa [#allocation3], 0  ;;  %s1371_s0 = inlined_call_operand.hbm [shape: f32[2,8,16], index: 0, kind: input, shape index: {}]   ;;  %s1372_s1 = inlined_call_operand.hbm [shape: bf16[7,8,8], index: 1, kind: input, shape index: {}]   ;;  %s1373_s2 = inlined_call_operand.hbm [shape: bf16[7,8,8], index: 2, kind: input, shape index: {}]   ;;  %s1374_s3 = inlined_call_operand.hbm [shape: bf16[2,8,16], index: 3, kind: output, shape index: {}]  }
   0x1   :  { %9 = vsyncpa [#allocation6], 0  ;;  %s28_s14 = sshll.u32 %s1372_s1, 4  ;;  %s29_s14 = int_to_ptr.hbm [resolvable:$true] %s28_s14 }
   0x2   :  { %10 = vsyncpa [#allocation4], 0  ;;  %s1094_s15 = smov [#allocation5]   ;;  %s15_s19 = sshll.u32 %s1371_s0, 4  ;;  %s16_s19 = int_to_ptr.hbm [resolvable:$true] %s15_s19 }
   0x3   :  { %s30_s16 = sshll.u32 %s1094_s15, 4  ;;  %s1095_s20 = smov 64   ;;  %s31_s16 = int_to_ptr.vmem [resolvable:$true] %s30_s16 }
   0x4   :  { %s1096_s21 = smov 4   ;;  %s1097_s22 = smov [#allocation2]  }
   0x5   :  { %36 = dma.hbm_to_vmem [thread:$0]  %s29_s14, 448, %s31_s16, [#allocation6], %s1095_s20, %s1095_s20, %s1096_s21  }
   0x6   :  { %s17_s23 = sshll.u32 %s1097_s22, 4  ;;  %s1098_s1 = smov 128   ;;  %s18_s23 = int_to_ptr.vmem [resolvable:$true] %s17_s23 }
   0x7   :  { %s1099_s24 = smov 8   ;;  %s41_s27 = sshll.u32 %s1373_s2, 4  ;;  %s42_s27 = int_to_ptr.hbm [resolvable:$true] %s41_s27 }
   0x8   :  { %23 = dma.hbm_to_vmem [thread:$0]  %s16_s19, 256, %s18_s23, [#allocation3], %s1098_s1, %s1098_s1, %s1099_s24  }
   0x9   :  { %s1100_s28 = smov [#allocation7]  }
   0xa   :  { %s43_s0 = sshll.u32 %s1100_s28, 4  ;;  %s44_s0 = int_to_ptr.vmem [resolvable:$true] %s43_s0 }
   0xb   :  { %49 = dma.hbm_to_vmem [thread:$0]  %s42_s27, 448, %s44_s0, [#allocation6], %s1095_s20, %s1095_s20, %s1096_s21  }
   0xc   :  { %1088 = dma.done.wait [#allocation3], 256  }
   0xd   :  { %1089 = vsyncadd [#allocation3], 4294967040 }
   0xe   :  { %1090 = dma.done.wait [#allocation6], 896  }
   0xf   :  { %1091 = vsyncadd [#allocation6], 4294966400  ;;  %v1149_v0 = vld [vmem:[#allocation2] sm:$0xff]  ;;  %s1101_s2 = smov 114   ;;  %s1102_s29 = smov 113   ;;  %v63_v4 = vlaneseq  ;;  %vm105_vm0 = vcmask 1043456  }
  0x10   :  { %v72_v1 = vpack.c.bf16 %v1149_v0, %v1149_v0  ;;  %s1103_s30 = smov 115   ;;  %s1104_s4 = smov 2   ;;  %vm80_vm2 = vcmask 23552   ;;  %vm101_vm4 = vcmask 64512   ;;  %v175_v9 = vld [vmem:[#allocation5 + $0xc] sm:$0xf] }
  0x11   :  { %s1105_s5 = smov 1   ;;  %s1106_s6 = smov 3   ;;  %v64_v6 = vand.u32 127, %v63_v4  ;;  %v87_v14 = vld [vmem:[#allocation5] sm:$0xf]  ;;  %vm92_vm7 = vcmask 15360  }
  0x12   :  { %v74_v2 = vunpack.c.l.b16 %v72_v1  ;;  %s1107_s7 = smov 13   ;;  %s1108_s8 = smov 125   ;;  %v180_v7 = vsel %vm105_vm0, %v72_v1, 0  ;;  %vm145_vm9 = vcmask 7168   ;;  %v100_v27 = vld [vmem:[#allocation5 + $0x4] sm:$0xf] }
  0x13   :  { %s1109_s9 = smov 127   ;;  %s1110_s10 = smov 126   ;;  %vm65_vm1 = vcmp.ge.s32.totalorder %v64_v6, 3  ;;  %189 = vmatpush.bf16.msra.mxu3 %v180_v7  ;;  %vm66_vm5 = vcmp.ge.s32.totalorder %v64_v6, 2  ;;  %vm67_vm6 = vcmp.ge.s32.totalorder %v64_v6, 1  ;;  %vm70_vm11 = vcmp.lt.s32.totalorder %v64_v6, 13 }
  0x14   :  { %v75_v3 = vpack.c.b16 %v74_v2, %v74_v2  ;;  %s1111_s11 = smov 15   ;;  %s1112_s12 = smov 14   ;;  %vm1166_vm3 = vmpackc.low %vm65_vm1, %vm65_vm1  ;;  %v153_v28 = vld [vmem:[#allocation5 + $0x8] sm:$0xf]  ;;  %vm266_vm12 = vcmask 105472   ;;  %vm68_vm14 = vcmp.lt.s32.totalorder %v64_v6, 15 }
  0x15   :  { %vm1176_vm8 = vmpackc.low %vm66_vm5, %vm66_vm5  ;;  %vm69_vm15 = vcmp.lt.s32.totalorder %v64_v6, 14  ;;  %vm233_vm1 = vcmask 113664   ;;  %vm200_vm5 = vcmask 121856   ;;  %v208_v47 = vld [vmem:[#allocation5 + $0x10] sm:$0xf]  ;;  %s1113_s13 = smov [#allocation8]  }
  0x16   :  { %88 = vrot.lane.b32.xlu1 %v75_v3, %s1101_s2  ;;  %141 = vrot.lane.b32.xlu0 %v75_v3, %s1102_s29  ;;  %vm1180_vm10 = vmpackc.low %vm67_vm6, %vm67_vm6  ;;  %v241_v48 = vld [vmem:[#allocation5 + $0x14] sm:$0xf]  ;;  %v274_v49 = vld [vmem:[#allocation5 + $0x18] sm:$0xf]  ;;  %s928_s14 = sshll.u32 %s1113_s13, 4  ;;  %s930_s17 = sshll.u32 %s1374_s3, 4  ;;  %s929_s14 = int_to_ptr.vmem [resolvable:$true] %s928_s14  ;;  %s931_s17 = int_to_ptr.hbm [resolvable:$true] %s930_s17 }
  0x17   :  { %76 = vrot.lane.b32.xlu2 %v75_v3, %s1103_s30  ;;  %947 = vmatmul.msk.bf16.vlgmr.msra.gmra.mxu3 %vm101_vm4, %v175_v9  ;;  %vm1194_vm13 = vmpackc.low %vm70_vm11, %vm70_vm11 }
  0x18   :  { %vm1202_vm6 = vmpackc.low %vm68_vm14, %vm68_vm14  ;;  %vm508_vm14 = vcmask 125952  }
  0x19   :  { %vm1206_vm11 = vmpackc.low %vm69_vm15, %vm69_vm15 }
  0x1e   :  { %90 = vrot.lane.b32.xlu1 %v75_v3, %s1104_s4  ;;  %143 = vrot.lane.b32.xlu0 %v75_v3, %s1105_s5 }
  0x1f   :  { %78 = vrot.lane.b32.xlu2 %v75_v3, %s1106_s6 }
  0x26   :  { %264 = vrot.lane.b32.xlu1 %v75_v3, %s1107_s7  ;;  %262 = vrot.lane.b32.xlu0 %v75_v3, %s1108_s8 }
  0x27   :  { %196 = vrot.lane.b32.xlu2 %v75_v3, %s1109_s9 }
  0x2e   :  { %229 = vrot.lane.b32.xlu1 %v75_v3, %s1110_s10  ;;  %198 = vrot.lane.b32.xlu0 %v75_v3, %s1111_s11 }
  0x2f   :  { %231 = vrot.lane.b32.xlu2 %v75_v3, %s1112_s12 }
  0x71   :  { %v77_v5 = vpop.permute.xlu2 %76 }
  0x79   :  { %v79_v10 = vpop.permute.xlu2 %78 }
  0x7a   :  { %v83_v11 = vsel %vm80_vm2, %v77_v5, %v79_v10 }
  0x7b   :  { %v86_v12 = vsel %vm1166_vm3, %v83_v11, 0 }
  0x7c   :  { %v126_v13 = vsel %vm105_vm0, %v86_v12, 0 }
  0x7d   :  { %135 = vmatpush.bf16.msra.mxu1 %v126_v13  ;;  %v1225_v13 = vld [vmem:[#allocation2 + $0x8] sm:$0xff] }
  0x80   :  { %945 = vmatmul.msk.bf16.vlgmr.msra.gmra.mxu1 %vm101_vm4, %v87_v14  ;;  %v1229_v14 = vpack.c.bf16 %v1225_v13, %v1225_v13 }
  0x81   :  { %v197_v29 = vpop.permute.xlu2 %196 }
  0x88   :  { %v89_v15 = vpop.permute.xlu1 %88  ;;  %v142_v16 = vpop.permute.xlu0 %141 }
  0x89   :  { %v232_v36 = vpop.permute.xlu2 %231 }
  0x90   :  { %v91_v19 = vpop.permute.xlu1 %90  ;;  %v144_v20 = vpop.permute.xlu0 %143 }
  0x91   :  { %v95_v21 = vsel %vm92_vm7, %v89_v15, %v91_v19  ;;  %v148_v22 = vsel %vm145_vm9, %v142_v16, %v144_v20  ;;  %v514_v15 = vunpack.c.l.b16 %v1229_v14  ;;  %v391_v19 = vld [vmem:[#allocation7 + $0xc] sm:$0xf] }
  0x92   :  { %v98_v23 = vsel %vm1176_vm8, %v95_v21, 0  ;;  %v151_v24 = vsel %vm1180_vm10, %v148_v22, 0 }
  0x93   :  { %v107_v25 = vsel %vm105_vm0, %v98_v23, 0  ;;  %v158_v26 = vsel %vm105_vm0, %v151_v24, 0  ;;  %v515_v16 = vpack.c.b16 %v514_v15, %v514_v15 }
  0x94   :  { %116 = vmatpush.bf16.msra.mxu0 %v107_v25  ;;  %167 = vmatpush.bf16.msra.mxu2 %v158_v26 }
  0x97   :  { %944 = vmatmul.msk.bf16.vlgmr.msra.gmra.mxu0 %vm101_vm4, %v100_v27  ;;  %946 = vmatmul.msk.bf16.vlgmr.msra.gmra.mxu2 %vm101_vm4, %v153_v28  ;;  %v320_v27 = vld [vmem:[#allocation7 + $0x4] sm:$0xf] }
  0x98   :  { %v265_v31 = vpop.permute.xlu1 %264  ;;  %v263_v32 = vpop.permute.xlu0 %262 }
  0x99   :  { %v269_v33 = vsel %vm266_vm12, %v263_v32, %v265_v31 }
  0x9a   :  { %v272_v34 = vsel %vm1194_vm13, %v269_v33, 0  ;;  %v191_v50 = vpop.f32.mrf.mxu3 }
  0x9b   :  { %v279_v35 = vsel %vm105_vm0, %v272_v34, 0 }
  0x9c   :  { %288 = vmatpush.bf16.msrb.mxu2 %v279_v35 }
  0xa0   :  { %v230_v39 = vpop.permute.xlu1 %229  ;;  %v199_v40 = vpop.permute.xlu0 %198 }
  0xa1   :  { %v236_v41 = vsel %vm233_vm1, %v230_v39, %v232_v36  ;;  %v203_v42 = vsel %vm200_vm5, %v197_v29, %v199_v40  ;;  %v309_v40 = vld [vmem:[#allocation7] sm:$0xf] }
  0xa2   :  { %v206_v43 = vsel %vm1202_vm6, %v203_v42, 0  ;;  %v239_v44 = vsel %vm1206_vm11, %v236_v41, 0  ;;  %v193_v52 = vpop.f32.mrf.mxu3 }
  0xa3   :  { %v213_v45 = vsel %vm105_vm0, %v206_v43, 0  ;;  %v246_v46 = vsel %vm105_vm0, %v239_v44, 0 }
  0xa4   :  { %222 = vmatpush.bf16.msrb.mxu0 %v213_v45  ;;  %255 = vmatpush.bf16.msrb.mxu1 %v246_v46 }
  0xa7   :  { %948 = vmatmul.msk.bf16.vlgmr.msrb.gmra.mxu0 %vm101_vm4, %v208_v47  ;;  %949 = vmatmul.msk.bf16.vlgmr.msrb.gmra.mxu1 %vm101_vm4, %v241_v48  ;;  %v369_v47 = vld [vmem:[#allocation7 + $0x8] sm:$0xf]  ;;  %v422_v48 = vld [vmem:[#allocation7 + $0x10] sm:$0xf] }
  0xa8   :  { %950 = vmatmul.msk.bf16.vlgmr.msrb.gmra.mxu2 %vm101_vm4, %v274_v49 }
  0xfd   :  { %v137_v51 = vpop.f32.mrf.mxu1 }
 0x105   :  { %v139_v53 = vpop.f32.mrf.mxu1 }
 0x114   :  { %v118_v54 = vpop.f32.mrf.mxu0 }
 0x115   :  { %v138_v57 = vadd.f32 %v137_v51, %v118_v54 }
 0x11a   :  { %v169_v55 = vpop.f32.mrf.mxu2 }
 0x11b   :  { %v173_v58 = vadd.f32 %v169_v55, %v138_v57  ;;  %v535_v55 = vld [vmem:[#allocation5 + $0x4] sm:$0xf] }
 0x11c   :  { %v120_v56 = vpop.f32.mrf.mxu0 }
 0x11d   :  { %v195_v60 = vadd.f32 %v191_v50, %v173_v58 }
 0x122   :  { %v171_v59 = vpop.f32.mrf.mxu2 }
 0x124   :  { %v224_v61 = vpop.f32.mrf.mxu0  ;;  %v257_v62 = vpop.f32.mrf.mxu1 }
 0x125   :  { %v228_v63 = vadd.f32 %v224_v61, %v195_v60 }
 0x127   :  { %v261_v1 = vadd.f32 %v257_v62, %v228_v63 }
 0x12b   :  { %v290_v2 = vpop.f32.mrf.mxu2 }
 0x12c   :  { %v294_v3 = vadd.f32 %v290_v2, %v261_v1  ;;  %v226_v4 = vpop.f32.mrf.mxu0  ;;  %v259_v5 = vpop.f32.mrf.mxu1  ;;  %v453_v2 = vld [vmem:[#allocation7 + $0x14] sm:$0xf] }
 0x12e   :  { %v295_v6 = vmax.f32 %v294_v3, 0.0  ;;  %v525_v3 = vld [vmem:[#allocation5] sm:$0xf] }
 0x130   :  { %v296_v7 = vpack.c.bf16 %v295_v6, %v295_v6 }
 0x132   :  { %v298_v9 = vunpack.c.l.b16 %v296_v7  ;;  %v396_v10 = vsel %vm105_vm0, %v296_v7, 0 }
 0x133   :  { %v292_v11 = vpop.f32.mrf.mxu2  ;;  %405 = vmatpush.bf16.msra.mxu2 %v396_v10 }
 0x134   :  { %v299_v12 = vpack.c.b16 %v298_v9, %v298_v9 }
 0x136   :  { %300 = vrot.lane.b32.xlu2 %v299_v12, %s1103_s30  ;;  %312 = vrot.lane.b32.xlu1 %v299_v12, %s1104_s4 }
 0x137   :  { %310 = vrot.lane.b32.xlu0 %v299_v12, %s1101_s2  ;;  %954 = vmatmul.msk.bf16.vlgmr.msra.gmra.mxu2 %vm101_vm4, %v391_v19  ;;  %v484_v19 = vld [vmem:[#allocation7 + $0x18] sm:$0xf] }
 0x13e   :  { %414 = vrot.lane.b32.xlu2 %v299_v12, %s1111_s11  ;;  %412 = vrot.lane.b32.xlu1 %v299_v12, %s1109_s9 }
 0x13f   :  { %302 = vrot.lane.b32.xlu0 %v299_v12, %s1106_s6 }
 0x146   :  { %528 = vrot.lane.b32.xlu2 %v515_v16, %s1104_s4  ;;  %361 = vrot.lane.b32.xlu1 %v299_v12, %s1105_s5 }
 0x147   :  { %359 = vrot.lane.b32.xlu0 %v299_v12, %s1102_s29 }
 0x14e   :  { %443 = vrot.lane.b32.xlu2 %v299_v12, %s1110_s10  ;;  %526 = vrot.lane.b32.xlu1 %v515_v16, %s1101_s2 }
 0x14f   :  { %516 = vrot.lane.b32.xlu0 %v515_v16, %s1103_s30 }
 0x156   :  { %474 = vrot.lane.b32.xlu2 %v299_v12, %s1108_s8  ;;  %518 = vrot.lane.b32.xlu1 %v515_v16, %s1106_s6 }
 0x157   :  { %445 = vrot.lane.b32.xlu0 %v299_v12, %s1112_s12 }
 0x15e   :  { %574 = vrot.lane.b32.xlu1 %v515_v16, %s1102_s29  ;;  %576 = vrot.lane.b32.xlu2 %v515_v16, %s1105_s5 }
 0x15f   :  { %476 = vrot.lane.b32.xlu0 %v299_v12, %s1107_s7  ;;  %v609_v12 = vsel %vm105_vm0, %v1229_v14, 0  ;;  %v583_v14 = vld [vmem:[#allocation5 + $0x8] sm:$0xf] }
 0x166   :  { %627 = vrot.lane.b32.xlu1 %v515_v16, %s1111_s11  ;;  %655 = vrot.lane.b32.xlu2 %v515_v16, %s1110_s10 }
 0x167   :  { %625 = vrot.lane.b32.xlu0 %v515_v16, %s1109_s9 }
 0x16e   :  { %685 = vrot.lane.b32.xlu1 %v515_v16, %s1108_s8  ;;  %687 = vrot.lane.b32.xlu2 %v515_v16, %s1107_s7 }
 0x16f   :  { %657 = vrot.lane.b32.xlu0 %v515_v16, %s1112_s12 }
 0x190   :  { %v301_v20 = vpop.permute.xlu2 %300 }
 0x198   :  { %v415_v21 = vpop.permute.xlu2 %414 }
 0x1a0   :  { %v529_v28 = vpop.permute.xlu2 %528 }
 0x1a8   :  { %v313_v22 = vpop.permute.xlu1 %312  ;;  %v444_v43 = vpop.permute.xlu2 %443 }
 0x1a9   :  { %v311_v23 = vpop.permute.xlu0 %310 }
 0x1aa   :  { %v316_v24 = vsel %vm92_vm7, %v311_v23, %v313_v22 }
 0x1ab   :  { %v318_v25 = vsel %vm1176_vm8, %v316_v24, 0 }
 0x1ac   :  { %v325_v26 = vsel %vm105_vm0, %v318_v25, 0  ;;  %v634_v25 = vld [vmem:[#allocation5 + $0x10] sm:$0xf] }
 0x1ad   :  { %334 = vmatpush.bf16.msrb.mxu3 %v325_v26 }
 0x1b0   :  { %951 = vmatmul.msk.bf16.vlgmr.msrb.gmra.mxu3 %vm101_vm4, %v320_v27  ;;  %v413_v29 = vpop.permute.xlu1 %412  ;;  %v475_v54 = vpop.permute.xlu2 %474 }
 0x1b1   :  { %v418_v31 = vsel %vm200_vm5, %v413_v29, %v415_v21  ;;  %v303_v32 = vpop.permute.xlu0 %302 }
 0x1b2   :  { %v420_v33 = vsel %vm1202_vm6, %v418_v31, 0  ;;  %v306_v34 = vsel %vm80_vm2, %v301_v20, %v303_v32 }
 0x1b3   :  { %v308_v35 = vsel %vm1166_vm3, %v306_v34, 0  ;;  %v427_v36 = vsel %vm105_vm0, %v420_v33, 0 }
 0x1b4   :  { %v344_v39 = vsel %vm105_vm0, %v308_v35, 0  ;;  %436 = vmatpush.bf16.msra.mxu3 %v427_v36  ;;  %v604_v36 = vld [vmem:[#allocation5 + $0xc] sm:$0xf] }
 0x1b5   :  { %353 = vmatpush.bf16.msra.mxu0 %v344_v39  ;;  %v664_v39 = vld [vmem:[#allocation5 + $0x14] sm:$0xf] }
 0x1b8   :  { %952 = vmatmul.msk.bf16.vlgmr.msra.gmra.mxu0 %vm101_vm4, %v309_v40  ;;  %v362_v41 = vpop.permute.xlu1 %361  ;;  %v577_v1 = vpop.permute.xlu2 %576  ;;  %v694_v40 = vld [vmem:[#allocation5 + $0x18] sm:$0xf] }
 0x1b9   :  { %v360_v42 = vpop.permute.xlu0 %359 }
 0x1ba   :  { %v365_v44 = vsel %vm145_vm9, %v360_v42, %v362_v41  ;;  %v407_v41 = vpop.f32.mrf.mxu2 }
 0x1bb   :  { %v367_v45 = vsel %vm1180_vm10, %v365_v44, 0 }
 0x1bc   :  { %v374_v46 = vsel %vm105_vm0, %v367_v45, 0 }
 0x1bd   :  { %383 = vmatpush.bf16.msra.mxu1 %v374_v46 }
 0x1c0   :  { %953 = vmatmul.msk.bf16.vlgmr.msra.gmra.mxu1 %vm101_vm4, %v369_v47  ;;  %955 = vmatmul.msk.bf16.vlgmr.msra.gmra.mxu3 %vm101_vm4, %v422_v48  ;;  %v527_v49 = vpop.permute.xlu1 %526  ;;  %v656_v16 = vpop.permute.xlu2 %655 }
 0x1c1   :  { %v532_v50 = vsel %vm92_vm7, %v527_v49, %v529_v28  ;;  %v517_v51 = vpop.permute.xlu0 %516 }
 0x1c2   :  { %v534_v52 = vsel %vm1176_vm8, %v532_v50, 0  ;;  %v409_v42 = vpop.f32.mrf.mxu2 }
 0x1c3   :  { %v540_v53 = vsel %vm105_vm0, %v534_v52, 0 }
 0x1c4   :  { %549 = vmatpush.bf16.msrb.mxu2 %v540_v53 }
 0x1c7   :  { %958 = vmatmul.msk.bf16.vlgmr.msrb.gmra.mxu2 %vm101_vm4, %v535_v55 }
 0x1c8   :  { %v519_v56 = vpop.permute.xlu1 %518  ;;  %v688_v26 = vpop.permute.xlu2 %687 }
 0x1c9   :  { %v522_v57 = vsel %vm80_vm2, %v517_v51, %v519_v56  ;;  %v446_v58 = vpop.permute.xlu0 %445 }
 0x1ca   :  { %v524_v59 = vsel %vm1166_vm3, %v522_v57, 0  ;;  %v449_v60 = vsel %vm233_vm1, %v444_v43, %v446_v58 }
 0x1cb   :  { %v451_v61 = vsel %vm1206_vm11, %v449_v60, 0  ;;  %v559_v62 = vsel %vm105_vm0, %v524_v59, 0 }
 0x1cc   :  { %v458_v63 = vsel %vm105_vm0, %v451_v61, 0  ;;  %568 = vmatpush.bf16.msrb.mxu3 %v559_v62 }
 0x1cd   :  { %467 = vmatpush.bf16.msrb.mxu0 %v458_v63 }
 0x1d0   :  { %956 = vmatmul.msk.bf16.vlgmr.msrb.gmra.mxu0 %vm101_vm4, %v453_v2  ;;  %959 = vmatmul.msk.bf16.vlgmr.msrb.gmra.mxu3 %vm101_vm4, %v525_v3  ;;  %v575_v4 = vpop.permute.xlu1 %574 }
 0x1d1   :  { %v477_v5 = vpop.permute.xlu0 %476  ;;  %v580_v6 = vsel %vm145_vm9, %v575_v4, %v577_v1 }
 0x1d2   :  { %v480_v7 = vsel %vm266_vm12, %v475_v54, %v477_v5  ;;  %v582_v9 = vsel %vm1180_vm10, %v580_v6, 0 }
 0x1d3   :  { %v482_v10 = vsel %vm1194_vm13, %v480_v7, 0  ;;  %v588_v11 = vsel %vm105_vm0, %v582_v9, 0 }
 0x1d4   :  { %v489_v15 = vsel %vm105_vm0, %v482_v10, 0  ;;  %597 = vmatpush.bf16.msra.mxu0 %v588_v11 }
 0x1d5   :  { %498 = vmatpush.bf16.msrb.mxu1 %v489_v15 }
 0x1d8   :  { %957 = vmatmul.msk.bf16.vlgmr.msrb.gmra.mxu1 %vm101_vm4, %v484_v19  ;;  %v628_v20 = vpop.permute.xlu1 %627 }
 0x1d9   :  { %618 = vmatpush.bf16.msra.mxu1 %v609_v12  ;;  %v626_v21 = vpop.permute.xlu0 %625 }
 0x1da   :  { %v631_v22 = vsel %vm200_vm5, %v626_v21, %v628_v20 }
 0x1db   :  { %v633_v23 = vsel %vm1202_vm6, %v631_v22, 0 }
 0x1dc   :  { %v639_v24 = vsel %vm105_vm0, %v633_v23, 0 }
 0x1dd   :  { %648 = vmatpush.bf16.msra.mxu2 %v639_v24 }
 0x1e0   :  { %960 = vmatmul.msk.bf16.vlgmr.msra.gmra.mxu0 %vm101_vm4, %v583_v14  ;;  %962 = vmatmul.msk.bf16.vlgmr.msra.gmra.mxu2 %vm101_vm4, %v634_v25  ;;  %v686_v27 = vpop.permute.xlu1 %685 }
 0x1e1   :  { %v658_v28 = vpop.permute.xlu0 %657  ;;  %v691_v29 = vsel %vm266_vm12, %v686_v27, %v688_v26 }
 0x1e2   :  { %v661_v31 = vsel %vm233_vm1, %v656_v16, %v658_v28  ;;  %v693_v32 = vsel %vm1194_vm13, %v691_v29, 0  ;;  %v808_v29 = vld [vmem:[#allocation7 + $0xc] sm:$0xf] }
 0x1e3   :  { %v663_v33 = vsel %vm1206_vm11, %v661_v31, 0  ;;  %v699_v34 = vsel %vm105_vm0, %v693_v32, 0 }
 0x1e4   :  { %v669_v35 = vsel %vm105_vm0, %v663_v33, 0  ;;  %708 = vmatpush.bf16.msrb.mxu0 %v699_v34 }
 0x1e5   :  { %678 = vmatpush.bf16.msra.mxu3 %v669_v35 }
 0x1e8   :  { %961 = vmatmul.msk.bf16.vlgmr.msra.gmra.mxu1 %vm101_vm4, %v604_v36  ;;  %963 = vmatmul.msk.bf16.vlgmr.msra.gmra.mxu3 %vm101_vm4, %v664_v39 }
 0x1f0   :  { %964 = vmatmul.msk.bf16.vlgmr.msrb.gmra.mxu0 %vm101_vm4, %v694_v40  ;;  %v729_v40 = vld [vmem:[#allocation7] sm:$0xf] }
 0x233   :  { %v336_v43 = vpop.f32.mrf.mxu3 }
 0x235   :  { %v355_v44 = vpop.f32.mrf.mxu0 }
 0x236   :  { %v356_v50 = vadd.f32 %v355_v44, %v336_v43 }
 0x23b   :  { %v338_v45 = vpop.f32.mrf.mxu3 }
 0x23d   :  { %v357_v46 = vpop.f32.mrf.mxu0  ;;  %v385_v47 = vpop.f32.mrf.mxu1 }
 0x23e   :  { %v389_v53 = vadd.f32 %v385_v47, %v356_v50 }
 0x240   :  { %v411_v55 = vadd.f32 %v407_v41, %v389_v53 }
 0x243   :  { %v438_v48 = vpop.f32.mrf.mxu3 }
 0x244   :  { %v442_v56 = vadd.f32 %v438_v48, %v411_v55  ;;  %v739_v48 = vld [vmem:[#allocation7 + $0x4] sm:$0xf] }
 0x245   :  { %v387_v49 = vpop.f32.mrf.mxu1 }
 0x246   :  { %v787_v49 = vld [vmem:[#allocation7 + $0x8] sm:$0xf] }
 0x24a   :  { %v551_v51 = vpop.f32.mrf.mxu2 }
 0x24b   :  { %v440_v52 = vpop.f32.mrf.mxu3 }
 0x24d   :  { %v469_v54 = vpop.f32.mrf.mxu0 }
 0x24e   :  { %v473_v59 = vadd.f32 %v469_v54, %v442_v56  ;;  %v868_v54 = vld [vmem:[#allocation7 + $0x14] sm:$0xf] }
 0x252   :  { %v553_v57 = vpop.f32.mrf.mxu2 }
 0x253   :  { %v570_v58 = vpop.f32.mrf.mxu3 }
 0x254   :  { %v571_v6 = vadd.f32 %v570_v58, %v551_v51 }
 0x255   :  { %v471_v60 = vpop.f32.mrf.mxu0  ;;  %v500_v61 = vpop.f32.mrf.mxu1 }
 0x256   :  { %v504_v62 = vadd.f32 %v500_v61, %v473_v59 }
 0x258   :  { %v505_v63 = vadd.f32 %v504_v62, %v1149_v0 }
 0x25a   :  { %v506_v1 = vmax.f32 %v505_v63, 0.0  ;;  %v838_v63 = vld [vmem:[#allocation7 + $0x10] sm:$0xf] }
 0x25b   :  { %v572_v2 = vpop.f32.mrf.mxu3 }
 0x25c   :  { %v507_v3 = vpack.c.bf16 %v506_v1, %v506_v1  ;;  %v898_v1 = vld [vmem:[#allocation7 + $0x18] sm:$0xf] }
 0x25d   :  { %v502_v4 = vpop.f32.mrf.mxu1  ;;  %v599_v5 = vpop.f32.mrf.mxu0 }
 0x25e   :  { %509 = vst.msk [vmem:[#allocation8] sm:$0xf] %vm508_vm14, %v507_v3  ;;  %v603_v9 = vadd.f32 %v599_v5, %v571_v6 }
 0x263   :  { %v650_v7 = vpop.f32.mrf.mxu2 }
 0x265   :  { %v601_v10 = vpop.f32.mrf.mxu0  ;;  %v620_v11 = vpop.f32.mrf.mxu1 }
 0x266   :  { %v624_v12 = vadd.f32 %v620_v11, %v603_v9 }
 0x268   :  { %v654_v15 = vadd.f32 %v650_v7, %v624_v12 }
 0x26b   :  { %v652_v16 = vpop.f32.mrf.mxu2  ;;  %v680_v19 = vpop.f32.mrf.mxu3 }
 0x26c   :  { %v684_v20 = vadd.f32 %v680_v19, %v654_v15 }
 0x26d   :  { %v622_v21 = vpop.f32.mrf.mxu1  ;;  %v710_v0 = vpop.f32.mrf.mxu0 }
 0x26e   :  { %v714_v22 = vadd.f32 %v710_v0, %v684_v20 }
 0x270   :  { %v715_v23 = vmax.f32 %v714_v22, 0.0 }
 0x272   :  { %v716_v24 = vpack.c.bf16 %v715_v23, %v715_v23 }
 0x273   :  { %v682_v14 = vpop.f32.mrf.mxu3 }
 0x274   :  { %v718_v25 = vunpack.c.l.b16 %v716_v24  ;;  %v813_v26 = vsel %vm105_vm0, %v716_v24, 0 }
 0x275   :  { %v712_v27 = vpop.f32.mrf.mxu0  ;;  %822 = vmatpush.bf16.msra.mxu0 %v813_v26 }
 0x276   :  { %v719_v28 = vpack.c.b16 %v718_v25, %v718_v25 }
 0x278   :  { %778 = vrot.lane.b32.xlu2 %v719_v28, %s1102_s29  ;;  %722 = vrot.lane.b32.xlu1 %v719_v28, %s1106_s6 }
 0x279   :  { %720 = vrot.lane.b32.xlu0 %v719_v28, %s1103_s30  ;;  %968 = vmatmul.msk.bf16.vlgmr.msra.gmra.mxu0 %vm101_vm4, %v808_v29 }
 0x280   :  { %732 = vrot.lane.b32.xlu2 %v719_v28, %s1104_s4  ;;  %730 = vrot.lane.b32.xlu1 %v719_v28, %s1101_s2 }
 0x281   :  { %780 = vrot.lane.b32.xlu0 %v719_v28, %s1105_s5 }
 0x288   :  { %889 = vrot.lane.b32.xlu2 %v719_v28, %s1108_s8  ;;  %861 = vrot.lane.b32.xlu1 %v719_v28, %s1112_s12 }
 0x289   :  { %859 = vrot.lane.b32.xlu0 %v719_v28, %s1110_s10 }
 0x290   :  { %831 = vrot.lane.b32.xlu2 %v719_v28, %s1111_s11  ;;  %829 = vrot.lane.b32.xlu1 %v719_v28, %s1109_s9 }
 0x291   :  { %891 = vrot.lane.b32.xlu0 %v719_v28, %s1107_s7 }
 0x2d2   :  { %v779_v31 = vpop.permute.xlu2 %778 }
 0x2da   :  { %v733_v36 = vpop.permute.xlu2 %732 }
 0x2e2   :  { %v890_v50 = vpop.permute.xlu2 %889 }
 0x2ea   :  { %v723_v32 = vpop.permute.xlu1 %722  ;;  %v832_v55 = vpop.permute.xlu2 %831 }
 0x2eb   :  { %v721_v33 = vpop.permute.xlu0 %720 }
 0x2ec   :  { %v726_v34 = vsel %vm80_vm2, %v721_v33, %v723_v32 }
 0x2ed   :  { %v728_v35 = vsel %vm1166_vm3, %v726_v34, 0 }
 0x2ee   :  { %v763_v39 = vsel %vm105_vm0, %v728_v35, 0 }
 0x2ef   :  { %772 = vmatpush.bf16.msrb.mxu2 %v763_v39 }
 0x2f2   :  { %v731_v41 = vpop.permute.xlu1 %730  ;;  %966 = vmatmul.msk.bf16.vlgmr.msrb.gmra.mxu2 %vm101_vm4, %v729_v40 }
 0x2f3   :  { %v736_v42 = vsel %vm92_vm7, %v731_v41, %v733_v36  ;;  %v781_v43 = vpop.permute.xlu0 %780 }
 0x2f4   :  { %v738_v44 = vsel %vm1176_vm8, %v736_v42, 0  ;;  %v784_v45 = vsel %vm145_vm9, %v779_v31, %v781_v43 }
 0x2f5   :  { %v786_v8 = vsel %vm1180_vm10, %v784_v45, 0  ;;  %v744_v46 = vsel %vm105_vm0, %v738_v44, 0 }
 0x2f6   :  { %753 = vmatpush.bf16.msrb.mxu1 %v744_v46  ;;  %v792_v47 = vsel %vm105_vm0, %v786_v8, 0  ;;  %v824_v2 = vpop.f32.mrf.mxu0 }
 0x2f7   :  { %801 = vmatpush.bf16.msrb.mxu3 %v792_v47 }
 0x2f9   :  { %965 = vmatmul.msk.bf16.vlgmr.msrb.gmra.mxu1 %vm101_vm4, %v739_v48 }
 0x2fa   :  { %v862_v51 = vpop.permute.xlu1 %861  ;;  %967 = vmatmul.msk.bf16.vlgmr.msrb.gmra.mxu3 %vm101_vm4, %v787_v49 }
 0x2fb   :  { %v860_v17 = vpop.permute.xlu0 %859 }
 0x2fc   :  { %v865_v52 = vsel %vm233_vm1, %v860_v17, %v862_v51 }
 0x2fd   :  { %v867_v18 = vsel %vm1206_vm11, %v865_v52, 0 }
 0x2fe   :  { %v873_v53 = vsel %vm105_vm0, %v867_v18, 0  ;;  %v826_v37 = vpop.f32.mrf.mxu0 }
 0x2ff   :  { %882 = vmatpush.bf16.msra.mxu2 %v873_v53 }
 0x302   :  { %v830_v56 = vpop.permute.xlu1 %829  ;;  %970 = vmatmul.msk.bf16.vlgmr.msra.gmra.mxu2 %vm101_vm4, %v868_v54 }
 0x303   :  { %v835_v57 = vsel %vm200_vm5, %v830_v56, %v832_v55  ;;  %v892_v58 = vpop.permute.xlu0 %891 }
 0x304   :  { %v837_v59 = vsel %vm1202_vm6, %v835_v57, 0  ;;  %v895_v60 = vsel %vm266_vm12, %v890_v50, %v892_v58 }
 0x305   :  { %v897_v38 = vsel %vm1194_vm13, %v895_v60, 0  ;;  %v843_v61 = vsel %vm105_vm0, %v837_v59, 0 }
 0x306   :  { %852 = vmatpush.bf16.msra.mxu1 %v843_v61  ;;  %v903_v62 = vsel %vm105_vm0, %v897_v38, 0 }
 0x307   :  { %912 = vmatpush.bf16.msra.mxu3 %v903_v62 }
 0x309   :  { %969 = vmatmul.msk.bf16.vlgmr.msra.gmra.mxu1 %vm101_vm4, %v838_v63 }
 0x30a   :  { %971 = vmatmul.msk.bf16.vlgmr.msra.gmra.mxu3 %vm101_vm4, %v898_v1 }
 0x375   :  { %v774_v3 = vpop.f32.mrf.mxu2 }
 0x376   :  { %v755_v4 = vpop.f32.mrf.mxu1 }
 0x377   :  { %v775_v7 = vadd.f32 %v774_v3, %v755_v4 }
 0x37d   :  { %v803_v5 = vpop.f32.mrf.mxu3  ;;  %v776_v6 = vpop.f32.mrf.mxu2 }
 0x37e   :  { %v757_v30 = vpop.f32.mrf.mxu1  ;;  %v807_v9 = vadd.f32 %v803_v5, %v775_v7 }
 0x380   :  { %v828_v12 = vadd.f32 %v824_v2, %v807_v9 }
 0x385   :  { %v805_v10 = vpop.f32.mrf.mxu3  ;;  %v884_v11 = vpop.f32.mrf.mxu2 }
 0x386   :  { %v854_v15 = vpop.f32.mrf.mxu1 }
 0x387   :  { %v858_v16 = vadd.f32 %v854_v15, %v828_v12 }
 0x389   :  { %v888_v19 = vadd.f32 %v884_v11, %v858_v16 }
 0x38d   :  { %v914_v20 = vpop.f32.mrf.mxu3  ;;  %v886_v21 = vpop.f32.mrf.mxu2 }
 0x38e   :  { %v918_v0 = vadd.f32 %v914_v20, %v888_v19  ;;  %v856_v22 = vpop.f32.mrf.mxu1 }
 0x390   :  { %v919_v23 = vadd.f32 %v918_v0, %v1225_v13 }
 0x392   :  { %v920_v24 = vmax.f32 %v919_v23, 0.0 }
 0x394   :  { %v921_v14 = vpack.c.bf16 %v920_v24, %v920_v24 }
 0x395   :  { %v916_v25 = vpop.f32.mrf.mxu3 }
 0x396   :  { %923 = vst.msk [vmem:[#allocation8 + $0x4] sm:$0xf] %vm508_vm14, %v921_v14 }
 0x397   :  { %936 = dma.vmem_to_hbm [thread:$0]  %s929_s14, 128, %s931_s17, [#allocation4], %s1095_s20, %s1095_s20, %s1096_s21  }
 0x398   :  { %1092 = dma.done.wait [#allocation4], 128  }
 0x399   :  { %1093 = vsyncadd [#allocation4], 4294967168 }
 0x39a   :  { %941 = vsyncpa [#allocation3], 1 }
 0x39b   :  { %942 = vsyncpa [#allocation6], 1 }
 0x39c   :  { %943 = vsyncpa [#allocation4], 1 }

</bundles_post_ra>
